<compile_context>
chip_gen: v6e
topology: v6e:2x2x1
jax: 0.10.0
libtpu: 0.0.40
codegen_flags: <defaults>
</compile_context>

<pallas_src>
import jax
import jax.numpy as jnp
from jax.experimental import pallas as pl
from jax.experimental.pallas import tpu as pltpu


# ----------------------------- model hyperparams -----------------------------
INPUT_DIM = 16
OUTPUT_DIM = 4
N_ATOMS = 8
HIDDEN = 128
V_MIN = -10.0
V_MAX = 10.0

OUT_FLAT = OUTPUT_DIM * N_ATOMS       # 32 meaningful output columns
PAD_OUT = 128                         # lane-dense padded output width

TILE_B = 2048                         # max batch tile (multiple of 256)


def _round_up(n, m):
    return ((n + m - 1) // m) * m


def _cdiv(a, b):
    return -(-a // b)


def _pick_tile(b):
    """Sublane-aligned batch tile; >=2 (even) grid steps for medium batches."""
    b8 = _round_up(max(b, 8), 8)
    if b8 <= 512:
        return b8                              # single step; nothing to split
    half = _round_up(_cdiv(b8, 2), 256)        # aim for a 2-step balanced grid
    return int(min(TILE_B, half))


# --------------------------------- kernel ------------------------------------
def _cdqn_kernel(x_ref, w1_ref, b1_ref, w2_ref, b2_ref, w3_ref, b3_ref, s_ref,
                 out_ref):
    # cast to bf16 in-kernel (VPU) instead of a separate XLA pass over x in HBM
    x = x_ref[...].astype(jnp.bfloat16)                              # (TB, 16)

    # fc1 + relu  (bf16 x bf16 -> f32 accumulate on the MXU)
    h = jnp.dot(x, w1_ref[...], preferred_element_type=jnp.float32) + b1_ref[...]
    h = jnp.maximum(h, 0.0).astype(jnp.bfloat16)

    # fc2 + relu
    h = jnp.dot(h, w2_ref[...], preferred_element_type=jnp.float32) + b2_ref[...]
    h = jnp.maximum(h, 0.0).astype(jnp.bfloat16)

    # fc3 -> logits (TB, 128) f32; only the first OUT_FLAT lanes are meaningful,
    # the rest come from zero-padded weights/bias (logit 0) and are discarded.
    logits = jnp.dot(h, w3_ref[...], preferred_element_type=jnp.float32) + b3_ref[...]

    # Per-action softmax on the full lane slab:
    #   a single row-wide max is a valid per-row constant shift for every
    #   per-action softmax; clamp at -60 so a segment far below the row max
    #   cannot underflow to a zero denominator.
    m = jnp.max(logits, axis=-1, keepdims=True)                      # (TB, 1)
    e = jnp.exp(jnp.maximum(logits - m, -60.0))                      # (TB, 128)

    # Per-action denominators via MXU segment-sum: S is block-diagonal ones
    # (groups of N_ATOMS consecutive lanes), so seg_sum[:, j] = sum over the
    # action segment containing lane j (already broadcast to all its lanes).
    seg_sum = jnp.dot(e, s_ref[...], preferred_element_type=jnp.float32,
                      precision=jax.lax.Precision.HIGHEST)

    # Exact normalization so every action distribution sums to 1 (~1e-6).
    out_ref[...] = e / seg_sum


# --------------------------------- wrapper ------------------------------------
def categorical_dqn_forward(x, params):
    """x: (B, INPUT_DIM) f32 -> (B, OUTPUT_DIM, N_ATOMS) f32 probabilities."""
    w1, b1, w2, b2, w3, b3 = params
    B = x.shape[0]

    # Zero-pad fc3 to 128 output columns -> lane-dense, unmasked output stores.
    w3p = jnp.pad(w3, ((0, 0), (0, PAD_OUT - OUT_FLAT)))
    b3p = jnp.pad(b3, ((0, 0), (0, PAD_OUT - OUT_FLAT)))

    # Block-diagonal segment-sum matrix (constant, stays resident in VMEM).
    seg = jnp.arange(PAD_OUT) // N_ATOMS
    s_mat = (seg[:, None] == seg[None, :]).astype(jnp.float32)

    tb = _pick_tile(B)
    grid = (_cdiv(B, tb),)          # ragged tail handled by blocked-spec edges

    def full_spec(shape):
        return pl.BlockSpec(shape, lambda i: (0, 0))   # resident across steps

    out = pl.pallas_call(
        _cdqn_kernel,
        out_shape=jax.ShapeDtypeStruct((B, PAD_OUT), jnp.float32),
        grid=grid,
        in_specs=[
            pl.BlockSpec((tb, INPUT_DIM), lambda i: (i, 0)),   # x tiled on batch
            full_spec(w1.shape), full_spec(b1.shape),
            full_spec(w2.shape), full_spec(b2.shape),
            full_spec(w3p.shape), full_spec(b3p.shape),
            full_spec(s_mat.shape),
        ],
        out_specs=pl.BlockSpec((tb, PAD_OUT), lambda i: (i, 0)),
        compiler_params=pltpu.CompilerParams(
            dimension_semantics=("parallel",)),        # v7x: 2 TCs split batch
    )(x.astype(jnp.float32), w1, b1, w2, b2, w3p, b3p, s_mat)

    return out[:, :OUT_FLAT].reshape(B, OUTPUT_DIM, N_ATOMS)


# ---------------------- deterministic parameter init --------------------------
def init_params(key):
    """PyTorch-style default init: U(-1/sqrt(fan_in), 1/sqrt(fan_in)).
    Weights stored bf16 (MXU-native), biases f32 (added post-accumulation)."""
    def linear(key, fan_in, fan_out):
        kw, kb = jax.random.split(key)
        bound = 1.0 / jnp.sqrt(fan_in)
        w = jax.random.uniform(kw, (fan_in, fan_out), jnp.float32, -bound, bound)
        b = jax.random.uniform(kb, (1, fan_out), jnp.float32, -bound, bound)
        return w.astype(jnp.bfloat16), b

    k1, k2, k3 = jax.random.split(key, 3)
    w1, b1 = linear(k1, INPUT_DIM, HIDDEN)
    w2, b2 = linear(k2, HIDDEN, HIDDEN)
    w3, b3 = linear(k3, HIDDEN, OUT_FLAT)
    return (w1, b1, w2, b2, w3, b3)


# ------------------------------ pure-JAX reference -----------------------------
def reference_forward(x, params):
    """Mirrors the kernel math (bf16 operands, f32 accumulation, f32 softmax)."""
    w1, b1, w2, b2, w3, b3 = params
    xb = x.astype(jnp.bfloat16)
    h = jnp.maximum(jnp.dot(xb, w1, preferred_element_type=jnp.float32) + b1, 0.0)
    h = jnp.maximum(jnp.dot(h.astype(jnp.bfloat16), w2,
                            preferred_element_type=jnp.float32) + b2, 0.0)
    logits = (jnp.dot(h.astype(jnp.bfloat16), w3,
                      preferred_element_type=jnp.float32) + b3)
    logits = logits.reshape(-1, OUTPUT_DIM, N_ATOMS)
    return jax.nn.softmax(logits, axis=2)


def _check(x, params):
    dist = jax.block_until_ready(categorical_dqn_forward(x, params))
    ref = reference_forward(x, params)
    assert dist.shape == (x.shape[0], OUTPUT_DIM, N_ATOMS)
    assert jnp.allclose(dist, ref, atol=2e-3, rtol=1e-3), "mismatch vs reference"
    # rows must be valid probability distributions over atoms
    assert jnp.allclose(jnp.sum(dist, axis=2), 1.0, atol=1e-3)
    return dist


if __name__ == "__main__":
    key = jax.random.PRNGKey(0)
    kx, kx2, kp = jax.random.split(key, 3)
    params = init_params(kp)

    # small batch (B=2) — single grid step with a ragged edge block
    x_small = jax.random.normal(kx, (2, INPUT_DIM), jnp.float32)
    dist = _check(x_small, params)

    # larger, non-divisible batch — exercises the 2-step grid + ragged tail path
    x_big = jax.random.normal(kx2, (1100, INPUT_DIM), jnp.float32)
    _check(x_big, params)

    # (get_action-style Q values, computed in plain JAX glue — not part of forward)
    # TODO(synk): epsilon-greedy action sampling (host RNG / argmax) stays outside
    # the kernel, as in the PyTorch get_action; optionally fuse q = probs @ Z into
    # the kernel if only Q-values are needed (8x less writeback).
    z = jnp.linspace(V_MIN, V_MAX, N_ATOMS)
    _q = jnp.sum(dist * z, axis=2)
    jax.block_until_ready(_q)

    print("KERNEL_OK")
</pallas_src>

<mosaic_0001>
module attributes {stable_mosaic.version = 11 : i64} {
  func.func @_cdqn_kernel(%arg0: i32, %arg1: memref<8x16xf32, #tpu.memory_space<vmem>>, %arg2: memref<16x128xbf16, #tpu.memory_space<vmem>>, %arg3: memref<1x128xf32, #tpu.memory_space<vmem>>, %arg4: memref<128x128xbf16, #tpu.memory_space<vmem>>, %arg5: memref<1x128xf32, #tpu.memory_space<vmem>>, %arg6: memref<128x128xbf16, #tpu.memory_space<vmem>>, %arg7: memref<1x128xf32, #tpu.memory_space<vmem>>, %arg8: memref<128x128xf32, #tpu.memory_space<vmem>>, %arg9: memref<8x128xf32, #tpu.memory_space<vmem>>) attributes {dimension_semantics = [#tpu.dimension_semantics<parallel>], iteration_bounds = array<i64: 1>, scalar_prefetch = 0 : i64, scratch_operands = 0 : i64, tpu.core_type = #tpu.core_type<tc>, window_params = [{transform_indices = @transform_0, window_bounds = array<i64: 8, 16>}, {pipeline_mode = #tpu.pipeline_mode<synchronous>, transform_indices = @transform_1, window_bounds = array<i64: 16, 128>}, {pipeline_mode = #tpu.pipeline_mode<synchronous>, transform_indices = @transform_2, window_bounds = array<i64: 1, 128>}, {pipeline_mode = #tpu.pipeline_mode<synchronous>, transform_indices = @transform_3, window_bounds = array<i64: 128, 128>}, {pipeline_mode = #tpu.pipeline_mode<synchronous>, transform_indices = @transform_4, window_bounds = array<i64: 1, 128>}, {pipeline_mode = #tpu.pipeline_mode<synchronous>, transform_indices = @transform_5, window_bounds = array<i64: 128, 128>}, {pipeline_mode = #tpu.pipeline_mode<synchronous>, transform_indices = @transform_6, window_bounds = array<i64: 1, 128>}, {pipeline_mode = #tpu.pipeline_mode<synchronous>, transform_indices = @transform_7, window_bounds = array<i64: 128, 128>}, {transform_indices = @transform_8, window_bounds = array<i64: 8, 128>}]} {
    %c0 = arith.constant 0 : index
    %c0_0 = arith.constant 0 : index
    %0 = vector.load %arg1[%c0, %c0_0] : memref<8x16xf32, #tpu.memory_space<vmem>>, vector<8x16xf32>
    %1 = arith.truncf %0 : vector<8x16xf32> to vector<8x16xbf16>
    %c0_1 = arith.constant 0 : index
    %c0_2 = arith.constant 0 : index
    %2 = vector.load %arg2[%c0_1, %c0_2] : memref<16x128xbf16, #tpu.memory_space<vmem>>, vector<16x128xbf16>
    %cst = arith.constant dense<0.000000e+00> : vector<8x128xf32>
    %3 = tpu.matmul %1, %2, %cst {dimension_numbers = #tpu.dot_dimension_numbers<[1], [0], [0], [1], [0, 0, 1, 1], [], []>} : vector<8x16xbf16>, vector<16x128xbf16>, vector<8x128xf32> -> vector<8x128xf32>
    %c0_3 = arith.constant 0 : index
    %c0_4 = arith.constant 0 : index
    %4 = vector.load %arg3[%c0_3, %c0_4] : memref<1x128xf32, #tpu.memory_space<vmem>>, vector<1x128xf32>
    %5 = vector.broadcast %4 : vector<1x128xf32> to vector<8x128xf32>
    %6 = arith.addf %3, %5 : vector<8x128xf32>
    %cst_5 = arith.constant 0.000000e+00 : f32
    %7 = vector.broadcast %cst_5 : f32 to vector<8x128xf32>
    %8 = arith.maximumf %6, %7 : vector<8x128xf32>
    %9 = arith.truncf %8 : vector<8x128xf32> to vector<8x128xbf16>
    %c0_6 = arith.constant 0 : index
    %c0_7 = arith.constant 0 : index
    %10 = vector.load %arg4[%c0_6, %c0_7] : memref<128x128xbf16, #tpu.memory_space<vmem>>, vector<128x128xbf16>
    %cst_8 = arith.constant dense<0.000000e+00> : vector<8x128xf32>
    %11 = tpu.matmul %9, %10, %cst_8 {dimension_numbers = #tpu.dot_dimension_numbers<[1], [0], [0], [1], [0, 0, 1, 1], [], []>} : vector<8x128xbf16>, vector<128x128xbf16>, vector<8x128xf32> -> vector<8x128xf32>
    %c0_9 = arith.constant 0 : index
    %c0_10 = arith.constant 0 : index
    %12 = vector.load %arg5[%c0_9, %c0_10] : memref<1x128xf32, #tpu.memory_space<vmem>>, vector<1x128xf32>
    %13 = vector.broadcast %12 : vector<1x128xf32> to vector<8x128xf32>
    %14 = arith.addf %11, %13 : vector<8x128xf32>
    %cst_11 = arith.constant 0.000000e+00 : f32
    %15 = vector.broadcast %cst_11 : f32 to vector<8x128xf32>
    %16 = arith.maximumf %14, %15 : vector<8x128xf32>
    %17 = arith.truncf %16 : vector<8x128xf32> to vector<8x128xbf16>
    %c0_12 = arith.constant 0 : index
    %c0_13 = arith.constant 0 : index
    %18 = vector.load %arg6[%c0_12, %c0_13] : memref<128x128xbf16, #tpu.memory_space<vmem>>, vector<128x128xbf16>
    %cst_14 = arith.constant dense<0.000000e+00> : vector<8x128xf32>
    %19 = tpu.matmul %17, %18, %cst_14 {dimension_numbers = #tpu.dot_dimension_numbers<[1], [0], [0], [1], [0, 0, 1, 1], [], []>} : vector<8x128xbf16>, vector<128x128xbf16>, vector<8x128xf32> -> vector<8x128xf32>
    %c0_15 = arith.constant 0 : index
    %c0_16 = arith.constant 0 : index
    %20 = vector.load %arg7[%c0_15, %c0_16] : memref<1x128xf32, #tpu.memory_space<vmem>>, vector<1x128xf32>
    %21 = vector.broadcast %20 : vector<1x128xf32> to vector<8x128xf32>
    %22 = arith.addf %19, %21 : vector<8x128xf32>
    %cst_17 = arith.constant dense<0xFF800000> : vector<8xf32>
    %23 = vector.multi_reduction <maximumf>, %22, %cst_17 [1] : vector<8x128xf32> to vector<8xf32>
    %24 = vector.shape_cast %23 : vector<8xf32> to vector<8x1xf32>
    %25 = vector.broadcast %24 : vector<8x1xf32> to vector<8x128xf32>
    %26 = arith.subf %22, %25 : vector<8x128xf32>
    %cst_18 = arith.constant -6.000000e+01 : f32
    %27 = vector.broadcast %cst_18 : f32 to vector<8x128xf32>
    %28 = arith.maximumf %26, %27 : vector<8x128xf32>
    %29 = math.exp %28 : vector<8x128xf32>
    %c0_19 = arith.constant 0 : index
    %c0_20 = arith.constant 0 : index
    %30 = vector.load %arg8[%c0_19, %c0_20] : memref<128x128xf32, #tpu.memory_space<vmem>>, vector<128x128xf32>
    %cst_21 = arith.constant dense<0.000000e+00> : vector<8x128xf32>
    %31 = tpu.matmul %29, %30, %cst_21 {dimension_numbers = #tpu.dot_dimension_numbers<[1], [0], [0], [1], [0, 0, 1, 1], [], []>, precision = #tpu.contract_precision<fp32>} : vector<8x128xf32>, vector<128x128xf32>, vector<8x128xf32> -> vector<8x128xf32>
    %32 = arith.divf %29, %31 : vector<8x128xf32>
    %c0_22 = arith.constant 0 : index
    %c0_23 = arith.constant 0 : index
    %33 = vector.load %arg9[%c0_22, %c0_23] : memref<8x128xf32, #tpu.memory_space<vmem>>, vector<8x128xf32>
    tpu.vector_store %arg9[%c0_22, %c0_23], %32 {strides = array<i32>} : memref<8x128xf32, #tpu.memory_space<vmem>>, vector<8x128xf32>,
    return
  }
  func.func @transform_0(%arg0: i32) -> (i32, i32) {
    %c0_i32 = arith.constant 0 : i32
    %c0_i32_0 = arith.constant 0 : i32
    return %arg0, %c0_i32 : i32, i32
  }
  func.func @transform_1(%arg0: i32) -> (i32, i32) {
    %c0_i32 = arith.constant 0 : i32
    %c0_i32_0 = arith.constant 0 : i32
    %c0_i32_1 = arith.constant 0 : i32
    return %c0_i32, %c0_i32_0 : i32, i32
  }
  func.func @transform_2(%arg0: i32) -> (i32, i32) {
    %c0_i32 = arith.constant 0 : i32
    %c0_i32_0 = arith.constant 0 : i32
    %c0_i32_1 = arith.constant 0 : i32
    return %c0_i32, %c0_i32_0 : i32, i32
  }
  func.func @transform_3(%arg0: i32) -> (i32, i32) {
    %c0_i32 = arith.constant 0 : i32
    %c0_i32_0 = arith.constant 0 : i32
    %c0_i32_1 = arith.constant 0 : i32
    return %c0_i32, %c0_i32_0 : i32, i32
  }
  func.func @transform_4(%arg0: i32) -> (i32, i32) {
    %c0_i32 = arith.constant 0 : i32
    %c0_i32_0 = arith.constant 0 : i32
    %c0_i32_1 = arith.constant 0 : i32
    return %c0_i32, %c0_i32_0 : i32, i32
  }
  func.func @transform_5(%arg0: i32) -> (i32, i32) {
    %c0_i32 = arith.constant 0 : i32
    %c0_i32_0 = arith.constant 0 : i32
    %c0_i32_1 = arith.constant 0 : i32
    return %c0_i32, %c0_i32_0 : i32, i32
  }
  func.func @transform_6(%arg0: i32) -> (i32, i32) {
    %c0_i32 = arith.constant 0 : i32
    %c0_i32_0 = arith.constant 0 : i32
    %c0_i32_1 = arith.constant 0 : i32
    return %c0_i32, %c0_i32_0 : i32, i32
  }
  func.func @transform_7(%arg0: i32) -> (i32, i32) {
    %c0_i32 = arith.constant 0 : i32
    %c0_i32_0 = arith.constant 0 : i32
    %c0_i32_1 = arith.constant 0 : i32
    return %c0_i32, %c0_i32_0 : i32, i32
  }
  func.func @transform_8(%arg0: i32) -> (i32, i32) {
    %c0_i32 = arith.constant 0 : i32
    %c0_i32_0 = arith.constant 0 : i32
    return %arg0, %c0_i32 : i32, i32
  }
}

</mosaic_0001>

<bundles_post_ra>
// kernel: tpu_custom_call.1
= control target key start
LH: loop header
LB: loop body
LE: loop exit
PB: predicated region body
PF: predicated region fallthrough
CT: control target
= control target key end

     0   :  { %13 = vsyncpa [#allocation3], 0  ;;  %s2125_s0 = inlined_call_operand.hbm [shape: f32[2,16], index: 0, kind: input, shape index: {}]   ;;  %s2126_s1 = inlined_call_operand.hbm [shape: bf16[16,128], index: 1, kind: input, shape index: {}]   ;;  %s2127_s2 = inlined_call_operand.vmem [shape: f32[1,128], index: 2, kind: input, shape index: {}]   ;;  %s2128_s3 = inlined_call_operand.hbm [shape: bf16[128,128], index: 3, kind: input, shape index: {}]   ;;  %s2129_s4 = inlined_call_operand.vmem [shape: f32[1,128], index: 4, kind: input, shape index: {}]   ;;  %s2130_s5 = inlined_call_operand.hbm [shape: bf16[128,128], index: 5, kind: input, shape index: {}]   ;;  %s2131_s6 = inlined_call_operand.vmem [shape: f32[1,128], index: 6, kind: input, shape index: {}]   ;;  %s2132_s7 = inlined_call_operand.hbm [shape: f32[128,128], index: 7, kind: input, shape index: {}]   ;;  %s2133_s8 = inlined_call_operand.hbm [shape: f32[2,128], index: 8, kind: output, shape index: {}]  }
   0x1   :  { %14 = vsyncpa [#allocation6], 0 }
   0x2   :  { %15 = vsyncpa [#allocation9], 0 }
   0x3   :  { %16 = vsyncpa [#allocation4], 0 }
   0x4   :  { %21 = vsyncadd [#allocation3], 96  ;;  %s1633_s27 = smov [#allocation5]  }
   0x5   :  { %s34_s28 = sshll.u32 %s1633_s27, 4  ;;  %s35_s28 = int_to_ptr.vmem [resolvable:$true] %s34_s28 }
   0x6   :  { %s1513_s29 = scalar_lea.vmem %s35_s28, 128  ;;  %p1518_p1 = scmp.lt.s32.totalorder %s35_s28, %s35_s28 }
   0x7   :  { %p1514_p0 = scmp.ne.s32.totalorder %s35_s28, %s1513_s29  ;;  %p1519_p2 = scmp.lt.s32.totalorder %s1513_s29, %s1513_s29 }
   0x9   :  { %p1520_p3 = por %p1519_p2, %p1518_p1 }
   0xb   :  { %p1521_p4 = pnand %p1520_p3, %p1514_p0 }
   0xd   :  { %1524 = shalt.err (!%p1521_p4)
}
   0xe   :  { %s1634_s30 = smov 64   ;;  %s1635_s9 = smov 4  }
   0xf   :  { %40 = dma.hbm_to_vmem [thread:$0]  %s2126_s1, 128, %s35_s28, [#allocation6], %s1634_s30, %s1634_s30, %s1635_s9  }
  0x10   :  { %s1636_s12 = smov [#allocation8]   ;;  %s1637_s14 = smov [#allocation2]  }
  0x11   :  { %s62_s13 = sshll.u32 %s1636_s12, 4  ;;  %s22_s15 = sshll.u32 %s1637_s14, 4  ;;  %s63_s13 = int_to_ptr.vmem [resolvable:$true] %s62_s13  ;;  %s23_s15 = int_to_ptr.vmem [resolvable:$true] %s22_s15 }
  0x12   :  { %s1533_s16 = scalar_lea.vmem %s63_s13, 1024  ;;  %p1538_p6 = scmp.lt.s32.totalorder %s63_s13, %s63_s13 }
  0x13   :  { %p1534_p5 = scmp.ne.s32.totalorder %s63_s13, %s1533_s16  ;;  %p1539_p7 = scmp.lt.s32.totalorder %s1533_s16, %s1533_s16 }
  0x15   :  { %p1540_p8 = por %p1539_p7, %p1538_p6 }
  0x17   :  { %p1541_p9 = pnand %p1540_p8, %p1534_p5 }
  0x19   :  { %1544 = shalt.err (!%p1541_p9)
}
  0x1a   :  { %68 = dma.hbm_to_vmem [thread:$0]  %s2130_s5, 1024, %s63_s13, [#allocation9], %s1634_s30, %s1634_s30, %s1635_s9  }
  0x1b   :  { %s1553_s1 = scalar_lea.vmem %s23_s15, 32  ;;  %s1557_s19 = scalar_lea.vmem %s23_s15, 128 }
  0x1c   :  { %p1554_p10 = scmp.ne.s32.totalorder %s23_s15, %s1553_s1  ;;  %p1558_p11 = scmp.lt.s32.totalorder %s23_s15, %s23_s15 }
  0x1d   :  { %p1559_p12 = scmp.lt.s32.totalorder %s1557_s19, %s1553_s1 }
  0x1f   :  { %p1560_p13 = por %p1559_p12, %p1558_p11 }
  0x21   :  { %p1561_p0 = pnand %p1560_p13, %p1554_p10 }
  0x23   :  { %1564 = shalt.err (!%p1561_p0)
}
  0x24   :  { %s1638_s20 = smov 32   ;;  %s1639_s21 = smov 2  }
  0x25   :  { %28 = dma.hbm_to_vmem [thread:$0]  %s2125_s0, 32, %s23_s15, [#allocation3], %s1638_s20, %s1638_s20, %s1639_s21  }
  0x26   :  { %s1640_s24 = smov [#allocation7]   ;;  %s1641_s25 = smov [#allocation10]  }
  0x27   :  { %s48_s5 = sshll.u32 %s1640_s24, 4  ;;  %s76_s26 = sshll.u32 %s1641_s25, 4  ;;  %s49_s5 = int_to_ptr.vmem [resolvable:$true] %s48_s5  ;;  %s77_s26 = int_to_ptr.vmem [resolvable:$true] %s76_s26 }
  0x28   :  { %s1573_s27 = scalar_lea.vmem %s49_s5, 1024  ;;  %p1578_p2 = scmp.lt.s32.totalorder %s49_s5, %s49_s5 }
  0x29   :  { %p1574_p1 = scmp.ne.s32.totalorder %s49_s5, %s1573_s27  ;;  %p1579_p3 = scmp.lt.s32.totalorder %s1573_s27, %s1573_s27 }
  0x2b   :  { %p1580_p4 = por %p1579_p3, %p1578_p2 }
  0x2d   :  { %p1581_p5 = pnand %p1580_p4, %p1574_p1 }
  0x2f   :  { %1584 = shalt.err (!%p1581_p5)
}
  0x30   :  { %54 = dma.hbm_to_vmem [thread:$0]  %s2128_s3, 1024, %s49_s5, [#allocation6], %s1634_s30, %s1634_s30, %s1635_s9  }
  0x31   :  { %s1593_s0 = scalar_lea.vmem %s77_s26, 2048  ;;  %p1598_p7 = scmp.lt.s32.totalorder %s77_s26, %s77_s26 }
  0x32   :  { %p1594_p6 = scmp.ne.s32.totalorder %s77_s26, %s1593_s0  ;;  %p1599_p8 = scmp.lt.s32.totalorder %s1593_s0, %s1593_s0 }
  0x34   :  { %p1600_p9 = por %p1599_p8, %p1598_p7 }
  0x36   :  { %p1601_p10 = pnand %p1600_p9, %p1594_p6 }
  0x38   :  { %1604 = shalt.err (!%p1601_p10)
}
  0x39   :  { %s1642_s10 = smov 128   ;;  %s1643_s11 = smov 8  }
  0x3a   :  { %82 = dma.hbm_to_vmem [thread:$0]  %s2132_s7, 2048, %s77_s26, [#allocation9], %s1642_s10, %s1642_s10, %s1643_s11  }
  0x3b   :  { %1625 = dma.done.wait [#allocation3], 128  }
  0x3c   :  { %1626 = vsyncadd [#allocation3], 4294967168 }
  0x3d   :  { %1627 = dma.done.wait [#allocation6], 1152  }
  0x3e   :  { %1628 = vsyncadd [#allocation6], 4294966144 }
  0x3f   :  { %1629 = dma.done.wait [#allocation9], 3072  }
  0x40   :  { %1630 = vsyncadd [#allocation9], 4294964224  ;;  %v1644_v0 = vmov 0.0   ;;  %vm1645_vm0 = vmmov 0   ;;  %v1484_v1 = vld [vmem:[#allocation5] sm:$0xff]   ;;  %v99_v2 = vld [vmem:[#allocation2] sm:$0xff] }
  0x41   :  { %1214 = vmatprep.subr.bf16.mxu0 %v1644_v0  ;;  %1216 = vmatprep.mubr.msk.bf16.mxu0 %vm1645_vm0, %v1644_v0  ;;  %v100_v3 = vpack.c.bf16 %v99_v2, %v99_v2  ;;  %vm116_vm1 = vcmask 130048   ;;  %v1485_v4 = vld [vmem:[#allocation7 + $0x38] sm:$0xff]   ;;  %v1486_v5 = vld [vmem:[#allocation7 + $0x30] sm:$0xff]   ;;  %v1487_v6 = vld [vmem:[#allocation7 + $0x28] sm:$0xff]  }
  0x42   :  { %1220 = vmatprep.subr.bf16.mxu1 %v1644_v0  ;;  %1236 = vmatprep.mubr.msk.bf16.mxu1 %vm1645_vm0, %v1644_v0  ;;  %v1488_v7 = vld [vmem:[#allocation7 + $0x20] sm:$0xff]   ;;  %v1489_v8 = vld [vmem:[#allocation7 + $0x18] sm:$0xff]   ;;  %v1490_v9 = vld [vmem:[#allocation7 + $0x10] sm:$0xff]  }
  0x43   :  { %1215 = vmatpush3.bf16.msra.mxu0 %v1484_v1  ;;  %1221 = vmatpush3.bf16.msra.mxu1 %v1485_v4  ;;  %v1491_v10 = vld [vmem:[#allocation7 + $0x8] sm:$0xff]   ;;  %v1492_v11 = vld [vmem:[#allocation7] sm:$0xff]   ;;  %v1493_v12 = vld [vmem:[#allocation8 + $0x38] sm:$0xff]  }
  0x44   :  { %1240 = vmatprep.subr.bf16.mxu0 %v1644_v0  ;;  %1222 = vmatprep.subr.bf16.mxu1 %v1644_v0  ;;  %v1494_v13 = vld [vmem:[#allocation8 + $0x30] sm:$0xff]   ;;  %v1495_v14 = vld [vmem:[#allocation8 + $0x28] sm:$0xff]   ;;  %v1496_v15 = vld [vmem:[#allocation8 + $0x20] sm:$0xff]  }
  0x45   :  { %v1497_v16 = vld [vmem:[#allocation8 + $0x18] sm:$0xff]   ;;  %v1498_v17 = vld [vmem:[#allocation8 + $0x10] sm:$0xff]   ;;  %v1499_v26 = vld [vmem:[#allocation8 + $0x8] sm:$0xff]  }
  0x46   :  { %1217 = vmatmul.mubr.msk.bf16.vlgmr.msra.gmra.mxu0 %vm116_vm1, %v100_v3  ;;  %v1071_v18 = vld [vmem:[%s2127_s2] ss:$0 sm:$0xff]  ;;  %v1500_v27 = vld [vmem:[#allocation8] sm:$0xff]   ;;  %v407_v36 = vld [vmem:[#allocation10 + $0x78] sm:$0xff] }
  0x47   :  { %1256 = vmatprep.mubr.msk.bf16.mxu0 %vm1645_vm0, %v1644_v0  ;;  %1223 = vmatpush3.bf16.msra.mxu1 %v1486_v5  ;;  %v1074_v28 = vld [vmem:[%s2129_s4] ss:$0 sm:$0xff]  ;;  %v405_v38 = vld [vmem:[#allocation10 + $0x68] sm:$0xff]  ;;  %v1754_v39 = vand.u32 4294901760, %v407_v36  ;;  %v404_v42 = vld [vmem:[#allocation10 + $0x60] sm:$0xff] }
  0x48   :  { %1224 = vmatprep.subr.bf16.mxu1 %v1644_v0  ;;  %1241 = vmatpush3.bf16.msra.mxu0 %v1493_v12  ;;  %v406_v37 = vld [vmem:[#allocation10 + $0x70] sm:$0xff]  ;;  %v1758_v41 = vand.u32 4294901760, %v405_v38  ;;  %v403_v43 = vld [vmem:[#allocation10 + $0x58] sm:$0xff]  ;;  %v1760_v44 = vand.u32 4294901760, %v404_v42 }
  0x49   :  { %1242 = vmatprep.subr.bf16.mxu0 %v1644_v0  ;;  %v1756_v40 = vand.u32 4294901760, %v406_v37  ;;  %v1762_v45 = vand.u32 4294901760, %v403_v43  ;;  %v1765_v46 = vsub.f32 %v407_v36, %v1754_v39  ;;  %v1083_v3 = vld [vmem:[%s2131_s6] ss:$0 sm:$0xff] }
  0x4a   :  { %v1771_v48 = vsub.f32 %v405_v38, %v1758_v41  ;;  %v1775_v49 = vsub.f32 %v404_v42, %v1760_v44 }
  0x4b   :  { %1225 = vmatpush3.bf16.msra.mxu1 %v1487_v6  ;;  %v1768_v47 = vsub.f32 %v406_v37, %v1756_v40  ;;  %v1778_v50 = vsub.f32 %v403_v43, %v1762_v45  ;;  %v502_v51 = vand.u32 4294901760, %v1765_v46 }
  0x4c   :  { %1226 = vmatprep.subr.bf16.mxu1 %v1644_v0  ;;  %1243 = vmatpush3.bf16.msra.mxu0 %v1494_v13  ;;  %v516_v53 = vand.u32 4294901760, %v1771_v48  ;;  %v523_v54 = vand.u32 4294901760, %v1775_v49 }
  0x4d   :  { %1244 = vmatprep.subr.bf16.mxu0 %v1644_v0  ;;  %v509_v52 = vand.u32 4294901760, %v1768_v47  ;;  %v503_v55 = vsub.f32 %v1765_v46, %v502_v51  ;;  %v530_v58 = vand.u32 4294901760, %v1778_v50 }
  0x4e   :  { %v517_v57 = vsub.f32 %v1771_v48, %v516_v53  ;;  %v524_v61 = vsub.f32 %v1775_v49, %v523_v54 }
  0x4f   :  { %1227 = vmatpush3.bf16.msra.mxu1 %v1488_v7  ;;  %v510_v56 = vsub.f32 %v1768_v47, %v509_v52  ;;  %v504_v59 = vand.u32 4294901760, %v503_v55  ;;  %v531_v63 = vsub.f32 %v1778_v50, %v530_v58  ;;  %v402_v7 = vld [vmem:[#allocation10 + $0x50] sm:$0xff]  ;;  %v395_v55 = vld [vmem:[#allocation10 + $0x18] sm:$0xff] }
  0x50   :  { %1228 = vmatprep.subr.bf16.mxu1 %v1644_v0  ;;  %1245 = vmatpush3.bf16.msra.mxu0 %v1495_v14  ;;  %v518_v62 = vand.u32 4294901760, %v517_v57  ;;  %v525_v1 = vand.u32 4294901760, %v524_v61  ;;  %v400_v14 = vld [vmem:[#allocation10 + $0x40] sm:$0xff] }
  0x51   :  { %1246 = vmatprep.subr.bf16.mxu0 %v1644_v0  ;;  %v511_v60 = vand.u32 4294901760, %v510_v56  ;;  %v532_v2 = vand.u32 4294901760, %v531_v63 }
  0x53   :  { %1229 = vmatpush3.bf16.msra.mxu1 %v1489_v8  ;;  %v1820_v8 = vand.u32 4294901760, %v402_v7 }
  0x54   :  { %1230 = vmatprep.subr.bf16.mxu1 %v1644_v0  ;;  %1247 = vmatpush3.bf16.msra.mxu0 %v1496_v15 }
  0x55   :  { %1248 = vmatprep.subr.bf16.mxu0 %v1644_v0 }
  0x57   :  { %1231 = vmatpush3.bf16.msra.mxu1 %v1490_v9 }
  0x58   :  { %1232 = vmatprep.subr.bf16.mxu1 %v1644_v0  ;;  %1249 = vmatpush3.bf16.msra.mxu0 %v1497_v16 }
  0x59   :  { %1250 = vmatprep.subr.bf16.mxu0 %v1644_v0 }
  0x5b   :  { %1233 = vmatpush3.bf16.msra.mxu1 %v1491_v10  ;;  %v401_v10 = vld [vmem:[#allocation10 + $0x48] sm:$0xff] }
  0x5c   :  { %1234 = vmatprep.subr.bf16.mxu1 %v1644_v0  ;;  %1251 = vmatpush3.bf16.msra.mxu0 %v1498_v17  ;;  %v1825_v12 = vand.u32 4294901760, %v401_v10  ;;  %v1833_v17 = vand.u32 4294901760, %v400_v14 }
  0x5d   :  { %1252 = vmatprep.subr.bf16.mxu0 %v1644_v0 }
  0x5e   :  { %v1831_v16 = vsub.f32 %v401_v10, %v1825_v12 }
  0x5f   :  { %1235 = vmatpush3.bf16.msra.mxu1 %v1492_v11  ;;  %v1823_v11 = vsub.f32 %v402_v7, %v1820_v8 }
  0x60   :  { %1260 = vmatprep.subr.mxu1 %v1644_v0  ;;  %1253 = vmatpush3.bf16.msra.mxu0 %v1499_v26 }
  0x61   :  { %1254 = vmatprep.subr.bf16.mxu0 %v1644_v0  ;;  %v537_v15 = vand.u32 4294901760, %v1823_v11 }
  0x64   :  { %1255 = vmatpush3.bf16.msra.mxu0 %v1500_v27 }
  0x65   :  { %1295 = vmatprep.subr.mxu0 %v1644_v0 }
 0x106   :  { %v154_v19 = vpop.f32.mrf.mxu0 }
 0x107   :  { %v155_v20 = vadd.f32 %v1071_v18, %v154_v19  ;;  %v399_v18 = vld [vmem:[#allocation10 + $0x38] sm:$0xff]  ;;  %v538_v19 = vsub.f32 %v1823_v11, %v537_v15 }
 0x108   :  { %v1218_v21 = vpop.f32.mrf.mxu0 }
 0x109   :  { %v160_v22 = vmax.f32 %v155_v20, 0.0  ;;  %v544_v20 = vand.u32 4294901760, %v1831_v16  ;;  %v1842_v21 = vsub.f32 %v400_v14, %v1833_v17 }
 0x10a   :  { %v157_v23 = vpop.f32.mrf.mxu0 }
 0x10b   :  { %v161_v24 = vpack.c.bf16 %v160_v22, %v160_v22  ;;  %v1844_v22 = vand.u32 4294901760, %v399_v18  ;;  %v398_v23 = vld [vmem:[#allocation10 + $0x30] sm:$0xff]  ;;  %v551_v26 = vand.u32 4294901760, %v1842_v21 }
 0x10c   :  { %v1219_v25 = vpop.f32.mrf.mxu0 }
 0x10d   :  { %1237 = vmatmul.mubr.bf16.vlgmr.msra.gmra.mxu1 %v161_v24  ;;  %v539_v24 = vand.u32 4294901760, %v538_v19  ;;  %v545_v25 = vsub.f32 %v1831_v16, %v544_v20  ;;  %v1853_v27 = vsub.f32 %v399_v18, %v1844_v22 }
 0x10e   :  { %1292 = vmatprep.mubr.msk.f32.mxu1 %vm1645_vm0, %v1644_v0  ;;  %1261 = vmatpush3.msra.mxu1 %v1754_v39 }
 0x10f   :  { %1262 = vmatprep.subr.mxu1 %v1644_v0 }
 0x110   :  { %1263 = vmatpush3.msra.mxu1 %v1756_v40 }
 0x111   :  { %1264 = vmatprep.subr.mxu1 %v1644_v0 }
 0x112   :  { %1265 = vmatpush3.msra.mxu1 %v1758_v41 }
 0x113   :  { %1266 = vmatprep.subr.mxu1 %v1644_v0 }
 0x114   :  { %1267 = vmatpush3.msra.mxu1 %v1760_v44 }
 0x115   :  { %1268 = vmatprep.subr.mxu1 %v1644_v0 }
 0x116   :  { %1269 = vmatpush3.msra.mxu1 %v1762_v45 }
 0x117   :  { %1270 = vmatprep.subr.mxu1 %v1644_v0 }
 0x118   :  { %1271 = vmatpush3.msra.mxu1 %v1820_v8 }
 0x119   :  { %1272 = vmatprep.subr.mxu1 %v1644_v0 }
 0x11a   :  { %1273 = vmatpush3.msra.mxu1 %v1825_v12 }
 0x11b   :  { %1274 = vmatprep.subr.mxu1 %v1644_v0 }
 0x11c   :  { %1275 = vmatpush3.msra.mxu1 %v1833_v17 }
 0x11d   :  { %1276 = vmatprep.subr.mxu1 %v1644_v0 }
 0x11e   :  { %1277 = vmatpush3.msra.mxu1 %v1844_v22 }
 0x11f   :  { %1278 = vmatprep.subr.mxu1 %v1644_v0 }
 0x1cd   :  { %v267_v29 = vpop.f32.mrf.mxu1 }
 0x1ce   :  { %v268_v30 = vadd.f32 %v1074_v28, %v267_v29  ;;  %v1856_v28 = vand.u32 4294901760, %v398_v23  ;;  %v397_v29 = vld [vmem:[#allocation10 + $0x28] sm:$0xff] }
 0x1cf   :  { %v1238_v31 = vpop.f32.mrf.mxu1 }
 0x1d0   :  { %v273_v32 = vmax.f32 %v268_v30, 0.0  ;;  %v546_v30 = vand.u32 4294901760, %v545_v25  ;;  %v552_v31 = vsub.f32 %v1842_v21, %v551_v26  ;;  %1279 = vmatpush3.msra.mxu1 %v1856_v28 }
 0x1d1   :  { %v270_v33 = vpop.f32.mrf.mxu1  ;;  %1280 = vmatprep.subr.mxu1 %v1644_v0 }
 0x1d2   :  { %v274_v34 = vpack.c.bf16 %v273_v32, %v273_v32  ;;  %v558_v32 = vand.u32 4294901760, %v1853_v27  ;;  %v1863_v33 = vand.u32 4294901760, %v397_v29  ;;  %v553_v36 = vand.u32 4294901760, %v552_v31 }
 0x1d3   :  { %v1239_v35 = vpop.f32.mrf.mxu1 }
 0x1d4   :  { %1257 = vmatmul.mubr.bf16.vlgmr.msra.gmra.mxu0 %v274_v34  ;;  %v1867_v34 = vsub.f32 %v398_v23, %v1856_v28  ;;  %v396_v35 = vld [vmem:[#allocation10 + $0x20] sm:$0xff]  ;;  %v559_v37 = vsub.f32 %v1853_v27, %v558_v32  ;;  %v1874_v38 = vsub.f32 %v397_v29, %v1863_v33  ;;  %1281 = vmatpush3.msra.mxu1 %v1863_v33 }
 0x1d5   :  { %1327 = vmatprep.mubr.msk.f32.mxu0 %vm1645_vm0, %v1644_v0  ;;  %1296 = vmatpush3.msra.mxu0 %v504_v59  ;;  %v1876_v42 = vand.u32 4294901760, %v396_v35 }
 0x1d6   :  { %1297 = vmatprep.subr.mxu0 %v1644_v0  ;;  %v565_v43 = vand.u32 4294901760, %v1867_v34  ;;  %v560_v56 = vand.u32 4294901760, %v559_v37  ;;  %v572_v57 = vand.u32 4294901760, %v1874_v38  ;;  %1282 = vmatprep.subr.mxu1 %v1644_v0 }
 0x1d7   :  { %1298 = vmatpush3.msra.mxu0 %v511_v60  ;;  %v1884_v59 = vsub.f32 %v396_v35, %v1876_v42  ;;  %v1886_v60 = vand.u32 4294901760, %v395_v55  ;;  %1283 = vmatpush3.msra.mxu1 %v1876_v42 }
 0x1d8   :  { %1299 = vmatprep.subr.mxu0 %v1644_v0  ;;  %v566_v61 = vsub.f32 %v1867_v34, %v565_v43  ;;  %v573_v63 = vsub.f32 %v1874_v38, %v572_v57  ;;  %1284 = vmatprep.subr.mxu1 %v1644_v0 }
 0x1d9   :  { %1300 = vmatpush3.msra.mxu0 %v518_v62  ;;  %v394_v62 = vld [vmem:[#allocation10 + $0x10] sm:$0xff]  ;;  %1285 = vmatpush3.msra.mxu1 %v1886_v60 }
 0x1da   :  { %1301 = vmatprep.subr.mxu0 %v1644_v0  ;;  %v567_v7 = vand.u32 4294901760, %v566_v61  ;;  %1286 = vmatprep.subr.mxu1 %v1644_v0 }
 0x1db   :  { %1302 = vmatpush3.msra.mxu0 %v525_v1  ;;  %v579_v1 = vand.u32 4294901760, %v1884_v59 }
 0x1dc   :  { %1303 = vmatprep.subr.mxu0 %v1644_v0 }
 0x1dd   :  { %1304 = vmatpush3.msra.mxu0 %v532_v2  ;;  %v1899_v2 = vsub.f32 %v395_v55, %v1886_v60  ;;  %v580_v14 = vsub.f32 %v1884_v59, %v579_v1 }
 0x1de   :  { %1305 = vmatprep.subr.mxu0 %v1644_v0 }
 0x1df   :  { %1306 = vmatpush3.msra.mxu0 %v539_v24  ;;  %v586_v18 = vand.u32 4294901760, %v1899_v2  ;;  %v581_v25 = vand.u32 4294901760, %v580_v14 }
 0x1e0   :  { %1307 = vmatprep.subr.mxu0 %v1644_v0 }
 0x1e1   :  { %1308 = vmatpush3.msra.mxu0 %v546_v30  ;;  %v587_v29 = vsub.f32 %v1899_v2, %v586_v18 }
 0x1e2   :  { %1309 = vmatprep.subr.mxu0 %v1644_v0 }
 0x1e3   :  { %1310 = vmatpush3.msra.mxu0 %v553_v36  ;;  %v588_v36 = vand.u32 4294901760, %v587_v29 }
 0x1e4   :  { %1311 = vmatprep.subr.mxu0 %v1644_v0 }
 0x1e5   :  { %1312 = vmatpush3.msra.mxu0 %v560_v56 }
 0x1e6   :  { %1313 = vmatprep.subr.mxu0 %v1644_v0 }
 0x1e7   :  { %1314 = vmatpush3.msra.mxu0 %v567_v7 }
 0x1e8   :  { %1315 = vmatprep.subr.mxu0 %v1644_v0 }
 0x294   :  { %v380_v4 = vpop.f32.mrf.mxu0 }
 0x295   :  { %v1817_v5 = vadd.f32 %v1083_v3, %v380_v4  ;;  %v1901_v3 = vand.u32 4294901760, %v394_v62  ;;  %v393_v4 = vld [vmem:[#allocation10 + $0x8] sm:$0xff] }
 0x296   :  { %v1258_v6 = vpop.f32.mrf.mxu0 }
 0x297   :  { %386 = vmax.xlane.f32.xlu0 %v1817_v5  ;;  %v392_v6 = vld [vmem:[#allocation10] sm:$0xff]  ;;  %v1915_v19 = vsub.f32 %v394_v62, %v1901_v3  ;;  %1287 = vmatpush3.msra.mxu1 %v1901_v3 }
 0x298   :  { %v383_v9 = vpop.f32.mrf.mxu0  ;;  %v1907_v10 = vand.u32 4294901760, %v392_v6  ;;  %1288 = vmatprep.subr.mxu1 %v1644_v0 }
 0x299   :  { %v1905_v9 = vand.u32 4294901760, %v393_v4  ;;  %v593_v30 = vand.u32 4294901760, %v1915_v19 }
 0x29a   :  { %v1259_v13 = vpop.f32.mrf.mxu0  ;;  %v1922_v24 = vsub.f32 %v392_v6, %v1907_v10 }
 0x29b   :  { %v574_v13 = vand.u32 4294901760, %v573_v63  ;;  %v1919_v23 = vsub.f32 %v393_v4, %v1905_v9  ;;  %1289 = vmatpush3.msra.mxu1 %v1905_v9  ;;  %v594_v37 = vsub.f32 %v1915_v19, %v593_v30 }
 0x29c   :  { %v607_v35 = vand.u32 4294901760, %v1922_v24  ;;  %1290 = vmatprep.subr.mxu1 %v1644_v0 }
 0x29d   :  { %1316 = vmatpush3.msra.mxu0 %v574_v13  ;;  %v600_v31 = vand.u32 4294901760, %v1919_v23  ;;  %1291 = vmatpush3.msra.mxu1 %v1907_v10  ;;  %v595_v61 = vand.u32 4294901760, %v594_v37 }
 0x29e   :  { %1317 = vmatprep.subr.mxu0 %v1644_v0  ;;  %v608_v56 = vsub.f32 %v1922_v24, %v607_v35  ;;  %1330 = vmatprep.subr.mxu1 %v1644_v0 }
 0x29f   :  { %1318 = vmatpush3.msra.mxu0 %v581_v25  ;;  %v601_v55 = vsub.f32 %v1919_v23, %v600_v31 }
 0x2a0   :  { %1319 = vmatprep.subr.mxu0 %v1644_v0  ;;  %v609_v63 = vand.u32 4294901760, %v608_v56 }
 0x2a1   :  { %1320 = vmatpush3.msra.mxu0 %v588_v36  ;;  %v602_v62 = vand.u32 4294901760, %v601_v55 }
 0x2a2   :  { %1321 = vmatprep.subr.mxu0 %v1644_v0 }
 0x2a3   :  { %1322 = vmatpush3.msra.mxu0 %v595_v61 }
 0x2a4   :  { %1323 = vmatprep.subr.mxu0 %v1644_v0 }
 0x2a5   :  { %1324 = vmatpush3.msra.mxu0 %v602_v62 }
 0x2a6   :  { %1325 = vmatprep.subr.mxu0 %v1644_v0 }
 0x2a7   :  { %1326 = vmatpush3.msra.mxu0 %v609_v63 }
 0x2a8   :  { %1365 = vmatprep.subr.mxu0 %v1644_v0 }
 0x320   :  { %v387_v4 = vpop.xlane.xlu0 %386 }
 0x321   :  { %v388_v6 = vsub.f32 %v1817_v5, %v387_v4 }
 0x323   :  { %v389_v7 = vmax.f32 %v388_v6, -60.0 }
 0x325   :  { %v390_v13 = vmul.f32 1.442695, %v389_v7 }
 0x327   :  { %1501 = vpow2.f32 %v390_v13 }
 0x334   :  { %v1953_v14 = vpop.eup %1501 }
 0x335   :  { %v1956_v25 = vand.u32 4294901760, %v1953_v14 }
 0x337   :  { %1328 = vmatmul.mubr.f32.vlgmr.msra.gmra.mxu0 %v1956_v25  ;;  %v1961_v29 = vsub.f32 %v1953_v14, %v1956_v25 }
 0x338   :  { %1366 = vmatpush3.msra.mxu0 %v1754_v39  ;;  %1397 = vmatprep.mubr.msk.f32.mxu0 %vm1645_vm0, %v1644_v0 }
 0x339   :  { %1367 = vmatprep.subr.mxu0 %v1644_v0  ;;  %v491_v5 = vand.u32 4294901760, %v1961_v29 }
 0x33a   :  { %1368 = vmatpush3.msra.mxu0 %v1756_v40 }
 0x33b   :  { %1369 = vmatprep.subr.mxu0 %v1644_v0  ;;  %v492_v36 = vsub.f32 %v1961_v29, %v491_v5 }
 0x33c   :  { %1370 = vmatpush3.msra.mxu0 %v1758_v41 }
 0x33d   :  { %1371 = vmatprep.subr.mxu0 %v1644_v0  ;;  %v493_v37 = vand.u32 4294901760, %v492_v36 }
 0x33e   :  { %1372 = vmatpush3.msra.mxu0 %v1760_v44 }
 0x33f   :  { %1373 = vmatprep.subr.mxu0 %v1644_v0  ;;  %1293 = vmatmul.mubr.f32.vlgmr.msra.gmra.mxu1 %v493_v37 }
 0x340   :  { %1331 = vmatpush3.msra.mxu1 %v1765_v46  ;;  %1374 = vmatpush3.msra.mxu0 %v1762_v45 }
 0x341   :  { %1332 = vmatprep.subr.mxu1 %v1644_v0  ;;  %1375 = vmatprep.subr.mxu0 %v1644_v0 }
 0x342   :  { %1333 = vmatpush3.msra.mxu1 %v1768_v47  ;;  %1376 = vmatpush3.msra.mxu0 %v1820_v8 }
 0x343   :  { %1334 = vmatprep.subr.mxu1 %v1644_v0  ;;  %1377 = vmatprep.subr.mxu0 %v1644_v0 }
 0x344   :  { %1335 = vmatpush3.msra.mxu1 %v1771_v48  ;;  %1378 = vmatpush3.msra.mxu0 %v1825_v12 }
 0x345   :  { %1336 = vmatprep.subr.mxu1 %v1644_v0  ;;  %1379 = vmatprep.subr.mxu0 %v1644_v0 }
 0x346   :  { %1337 = vmatpush3.msra.mxu1 %v1775_v49  ;;  %1380 = vmatpush3.msra.mxu0 %v1833_v17 }
 0x347   :  { %1338 = vmatprep.subr.mxu1 %v1644_v0  ;;  %1381 = vmatprep.subr.mxu0 %v1644_v0 }
 0x348   :  { %1339 = vmatpush3.msra.mxu1 %v1778_v50  ;;  %1382 = vmatpush3.msra.mxu0 %v1844_v22 }
 0x349   :  { %1340 = vmatprep.subr.mxu1 %v1644_v0  ;;  %1383 = vmatprep.subr.mxu0 %v1644_v0 }
 0x34a   :  { %1341 = vmatpush3.msra.mxu1 %v1823_v11  ;;  %1384 = vmatpush3.msra.mxu0 %v1856_v28 }
 0x34b   :  { %1342 = vmatprep.subr.mxu1 %v1644_v0  ;;  %1385 = vmatprep.subr.mxu0 %v1644_v0 }
 0x34c   :  { %1343 = vmatpush3.msra.mxu1 %v1831_v16  ;;  %1386 = vmatpush3.msra.mxu0 %v1863_v33 }
 0x34d   :  { %1344 = vmatprep.subr.mxu1 %v1644_v0  ;;  %1387 = vmatprep.subr.mxu0 %v1644_v0 }
 0x34e   :  { %1345 = vmatpush3.msra.mxu1 %v1842_v21  ;;  %1388 = vmatpush3.msra.mxu0 %v1876_v42 }
 0x34f   :  { %1346 = vmatprep.subr.mxu1 %v1644_v0  ;;  %1389 = vmatprep.subr.mxu0 %v1644_v0 }
 0x350   :  { %1347 = vmatpush3.msra.mxu1 %v1853_v27  ;;  %1390 = vmatpush3.msra.mxu0 %v1886_v60 }
 0x351   :  { %1348 = vmatprep.subr.mxu1 %v1644_v0  ;;  %1391 = vmatprep.subr.mxu0 %v1644_v0 }
 0x352   :  { %1349 = vmatpush3.msra.mxu1 %v1867_v34  ;;  %1392 = vmatpush3.msra.mxu0 %v1901_v3 }
 0x353   :  { %1350 = vmatprep.subr.mxu1 %v1644_v0  ;;  %1393 = vmatprep.subr.mxu0 %v1644_v0 }
 0x354   :  { %1351 = vmatpush3.msra.mxu1 %v1874_v38  ;;  %1394 = vmatpush3.msra.mxu0 %v1905_v9 }
 0x355   :  { %1352 = vmatprep.subr.mxu1 %v1644_v0  ;;  %1395 = vmatprep.subr.mxu0 %v1644_v0 }
 0x356   :  { %1353 = vmatpush3.msra.mxu1 %v1884_v59  ;;  %1396 = vmatpush3.msra.mxu0 %v1907_v10 }
 0x357   :  { %1354 = vmatprep.subr.mxu1 %v1644_v0  ;;  %1398 = vmatmul.mubr.f32.vlgmr.msra.gmra.mxu0 %v491_v5 }
 0x358   :  { %1435 = vmatprep.subr.mxu0 %v1644_v0  ;;  %1355 = vmatpush3.msra.mxu1 %v1899_v2 }
 0x359   :  { %1436 = vmatpush3.msra.mxu0 %v1754_v39  ;;  %1356 = vmatprep.subr.mxu1 %v1644_v0 }
 0x35a   :  { %1437 = vmatprep.subr.mxu0 %v1644_v0  ;;  %1357 = vmatpush3.msra.mxu1 %v1915_v19 }
 0x35b   :  { %1438 = vmatpush3.msra.mxu0 %v1756_v40  ;;  %1358 = vmatprep.subr.mxu1 %v1644_v0 }
 0x35c   :  { %1439 = vmatprep.subr.mxu0 %v1644_v0  ;;  %1359 = vmatpush3.msra.mxu1 %v1919_v23 }
 0x35d   :  { %1440 = vmatpush3.msra.mxu0 %v1758_v41  ;;  %1360 = vmatprep.subr.mxu1 %v1644_v0 }
 0x35e   :  { %1441 = vmatprep.subr.mxu0 %v1644_v0  ;;  %1361 = vmatpush3.msra.mxu1 %v1922_v24 }
 0x35f   :  { %1362 = vmatprep.mubr.msk.f32.mxu1 %vm1645_vm0, %v1644_v0  ;;  %1442 = vmatpush3.msra.mxu0 %v1760_v44 }
 0x360   :  { %1363 = vmatmul.mubr.f32.vlgmr.msra.gmra.mxu1 %v1961_v29  ;;  %1400 = vmatprep.subr.mxu1 %v1644_v0 }
 0x361   :  { %1443 = vmatprep.subr.mxu0 %v1644_v0  ;;  %1401 = vmatpush3.msra.mxu1 %v502_v51 }
 0x362   :  { %1444 = vmatpush3.msra.mxu0 %v1762_v45  ;;  %1402 = vmatprep.subr.mxu1 %v1644_v0 }
 0x363   :  { %1445 = vmatprep.subr.mxu0 %v1644_v0  ;;  %1403 = vmatpush3.msra.mxu1 %v509_v52 }
 0x364   :  { %1446 = vmatpush3.msra.mxu0 %v1820_v8  ;;  %1404 = vmatprep.subr.mxu1 %v1644_v0 }
 0x365   :  { %1447 = vmatprep.subr.mxu0 %v1644_v0  ;;  %1405 = vmatpush3.msra.mxu1 %v516_v53 }
 0x366   :  { %1448 = vmatpush3.msra.mxu0 %v1825_v12  ;;  %1406 = vmatprep.subr.mxu1 %v1644_v0 }
 0x367   :  { %1449 = vmatprep.subr.mxu0 %v1644_v0  ;;  %1407 = vmatpush3.msra.mxu1 %v523_v54 }
 0x368   :  { %1450 = vmatpush3.msra.mxu0 %v1833_v17  ;;  %1408 = vmatprep.subr.mxu1 %v1644_v0 }
 0x369   :  { %1451 = vmatprep.subr.mxu0 %v1644_v0  ;;  %1409 = vmatpush3.msra.mxu1 %v530_v58 }
 0x36a   :  { %1452 = vmatpush3.msra.mxu0 %v1844_v22  ;;  %1410 = vmatprep.subr.mxu1 %v1644_v0 }
 0x36b   :  { %1453 = vmatprep.subr.mxu0 %v1644_v0  ;;  %1411 = vmatpush3.msra.mxu1 %v537_v15 }
 0x36c   :  { %1454 = vmatpush3.msra.mxu0 %v1856_v28  ;;  %1412 = vmatprep.subr.mxu1 %v1644_v0 }
 0x36d   :  { %1455 = vmatprep.subr.mxu0 %v1644_v0  ;;  %1413 = vmatpush3.msra.mxu1 %v544_v20 }
 0x36e   :  { %1456 = vmatpush3.msra.mxu0 %v1863_v33  ;;  %1414 = vmatprep.subr.mxu1 %v1644_v0 }
 0x36f   :  { %1457 = vmatprep.subr.mxu0 %v1644_v0  ;;  %1415 = vmatpush3.msra.mxu1 %v551_v26 }
 0x370   :  { %1458 = vmatpush3.msra.mxu0 %v1876_v42  ;;  %1416 = vmatprep.subr.mxu1 %v1644_v0 }
 0x371   :  { %1459 = vmatprep.subr.mxu0 %v1644_v0  ;;  %1417 = vmatpush3.msra.mxu1 %v558_v32 }
 0x372   :  { %1460 = vmatpush3.msra.mxu0 %v1886_v60  ;;  %1418 = vmatprep.subr.mxu1 %v1644_v0 }
 0x373   :  { %1461 = vmatprep.subr.mxu0 %v1644_v0  ;;  %1419 = vmatpush3.msra.mxu1 %v565_v43 }
 0x374   :  { %1462 = vmatpush3.msra.mxu0 %v1901_v3  ;;  %1420 = vmatprep.subr.mxu1 %v1644_v0 }
 0x375   :  { %1463 = vmatprep.subr.mxu0 %v1644_v0  ;;  %1421 = vmatpush3.msra.mxu1 %v572_v57 }
 0x376   :  { %1464 = vmatpush3.msra.mxu0 %v1905_v9  ;;  %1422 = vmatprep.subr.mxu1 %v1644_v0 }
 0x377   :  { %1465 = vmatprep.subr.mxu0 %v1644_v0  ;;  %1423 = vmatpush3.msra.mxu1 %v579_v1 }
 0x378   :  { %1466 = vmatpush3.msra.mxu0 %v1907_v10  ;;  %1467 = vmatprep.mubr.msk.f32.mxu0 %vm1645_vm0, %v1644_v0 }
 0x379   :  { %1424 = vmatprep.subr.mxu1 %v1644_v0  ;;  %1468 = vmatmul.mubr.f32.vlgmr.msra.gmra.mxu0 %v1956_v25 }
 0x37a   :  { %1425 = vmatpush3.msra.mxu1 %v586_v18  ;;  %1432 = vmatprep.mubr.msk.f32.mxu1 %vm1645_vm0, %v1644_v0 }
 0x37b   :  { %1426 = vmatprep.subr.mxu1 %v1644_v0 }
 0x37c   :  { %1427 = vmatpush3.msra.mxu1 %v593_v30 }
 0x37d   :  { %1428 = vmatprep.subr.mxu1 %v1644_v0 }
 0x37e   :  { %1429 = vmatpush3.msra.mxu1 %v600_v31 }
 0x37f   :  { %1430 = vmatprep.subr.mxu1 %v1644_v0 }
 0x380   :  { %1431 = vmatpush3.msra.mxu1 %v607_v35 }
 0x381   :  { %1433 = vmatmul.mubr.f32.vlgmr.msra.gmra.mxu1 %v1956_v25 }
 0x3f7   :  { %v646_v39 = vpop.f32.mrf.mxu0 }
 0x3f9   :  { %v1329_v40 = vpop.f32.mrf.mxu0 }
 0x3ff   :  { %v495_v41 = vpop.f32.mrf.mxu1 }
 0x400   :  { %v647_v50 = vadd.f32 %v646_v39, %v495_v41 }
 0x401   :  { %v1294_v44 = vpop.f32.mrf.mxu1 }
 0x417   :  { %v839_v45 = vpop.f32.mrf.mxu0 }
 0x419   :  { %v1399_v46 = vpop.f32.mrf.mxu0 }
 0x420   :  { %v750_v47 = vpop.f32.mrf.mxu1 }
 0x421   :  { %v751_v52 = vadd.f32 %v750_v47, %v647_v50 }
 0x422   :  { %v1364_v48 = vpop.f32.mrf.mxu1 }
 0x423   :  { %v840_v53 = vadd.f32 %v839_v45, %v751_v52 }
 0x439   :  { %v1045_v49 = vpop.f32.mrf.mxu0 }
 0x43b   :  { %v1469_v51 = vpop.f32.mrf.mxu0 }
 0x441   :  { %v958_v54 = vpop.f32.mrf.mxu1 }
 0x442   :  { %v959_v0 = vadd.f32 %v958_v54, %v840_v53 }
 0x443   :  { %v1434_v58 = vpop.f32.mrf.mxu1 }
 0x444   :  { %v1046_v8 = vadd.f32 %v1045_v49, %v959_v0 }
 0x446   :  { %1503 = vrcp.f32 %v1046_v8 }
 0x453   :  { %v1504_v11 = vpop.eup %1503 }
 0x454   :  { %v1050_v12 = vmul.f32 %v1504_v11, %v1953_v14 }
 0x456   :  { %1051 = vst [vmem:[#allocation11] sm:$0xff] %v1050_v12 }
 0x457   :  { %1056 = vsyncadd [#allocation4], 96  ;;  %s1646_s6 = smov [#allocation11]  }
 0x458   :  { %s1057_s14 = sshll.u32 %s1646_s6, 4  ;;  %s1058_s14 = int_to_ptr.vmem [resolvable:$true] %s1057_s14 }
 0x459   :  { %s1605_s15 = scalar_lea.vmem %s1058_s14, 32  ;;  %s1609_s16 = scalar_lea.vmem %s1058_s14, 128 }
 0x45a   :  { %p1606_p11 = scmp.ne.s32.totalorder %s1058_s14, %s1605_s15  ;;  %p1610_p12 = scmp.lt.s32.totalorder %s1058_s14, %s1058_s14 }
 0x45b   :  { %p1611_p13 = scmp.lt.s32.totalorder %s1609_s16, %s1605_s15 }
 0x45d   :  { %p1612_p0 = por %p1611_p13, %p1610_p12 }
 0x45f   :  { %p1613_p1 = pnand %p1612_p0, %p1606_p11 }
 0x461   :  { %1616 = shalt.err (!%p1613_p1)
}
 0x462   :  { %1063 = dma.vmem_to_hbm [thread:$0]  %s1058_s14, 32, %s2133_s8, [#allocation4], %s1638_s20, %s1638_s20, %s1639_s21  }
 0x463   :  { %1631 = dma.done.wait [#allocation4], 128  }
 0x464   :  { %1632 = vsyncadd [#allocation4], 4294967168 }
 0x465   :  { %1067 = vsyncpa [#allocation3], 1 }
 0x466   :  { %1068 = vsyncpa [#allocation6], 1 }
 0x467   :  { %1069 = vsyncpa [#allocation9], 1 }
 0x468   :  { %1070 = vsyncpa [#allocation4], 1 }

</bundles_post_ra>
